<compile_context>
chip_gen: v7x
topology: tpu7x:2x2x1
jax: 0.10.0
libtpu: 0.0.40
codegen_flags: <defaults>
</compile_context>

<pallas_src>
import functools
import math

import jax
import jax.numpy as jnp
from jax import lax
from jax.experimental import pallas as pl
from jax.experimental.pallas import tpu as pltpu


# ----------------------------- fused merge kernel ----------------------------
def _patch_merge_kernel(feat_ref, mask_ref, gb_ref, we_ref, wo_ref,
                        x_ref, m_ref, *, eps):
    # feat_ref: (rt, 2, w2, 2c)  dim 1 = row parity; col parity folded in lanes
    #           even rows -> channels [x0 | x2], odd rows -> [x1 | x3]
    # mask_ref: (rt, 2, w2, 2)
    # gb_ref:   (4, 2c)   rows = gamma_even, beta_even, gamma_odd, beta_odd
    # we_ref / wo_ref: (2c, cout) split halves of the (4c, cout) reduction weight
    # x_ref:    (rt*w2, cout)  natural matmul-result layout
    # m_ref:    (rt, w2, 1)
    xe = feat_ref[:, 0, :, :].astype(jnp.float32)       # (rt, w2, 2c)
    xo = feat_ref[:, 1, :, :].astype(jnp.float32)       # (rt, w2, 2c)
    rt, w2, c2 = xe.shape
    inv_c4 = 1.0 / (2 * c2)

    # LayerNorm(4c) statistics combined across the two slabs (no 4c concat).
    s = jnp.sum(xe, axis=-1, keepdims=True) + jnp.sum(xo, axis=-1, keepdims=True)
    ss = (jnp.sum(xe * xe, axis=-1, keepdims=True)
          + jnp.sum(xo * xo, axis=-1, keepdims=True))
    mu = s * inv_c4
    var = ss * inv_c4 - mu * mu
    rstd = lax.rsqrt(var + eps)                          # EUP slot

    ge = gb_ref[0:1, :]
    be = gb_ref[1:2, :]
    go = gb_ref[2:3, :]
    bo = gb_ref[3:4, :]
    ne = ((xe - mu) * rstd) * ge + be                    # (rt, w2, 2c)
    no = ((xo - mu) * rstd) * go + bo

    # Split (4c, cout) reduction as two (2c, cout) MXU matmuls, f32 accumulate.
    y = jnp.dot(ne.reshape(rt * w2, c2), we_ref[...],
                preferred_element_type=jnp.float32)
    y = y + jnp.dot(no.reshape(rt * w2, c2), wo_ref[...],
                    preferred_element_type=jnp.float32)
    x_ref[...] = y.astype(x_ref.dtype)

    # AdaptiveMaxPool2d((h/2, w/2)) == 2x2 max-pool of the scattered mask.
    me = mask_ref[:, 0, :, :]                            # (rt, w2, 2)
    mo = mask_ref[:, 1, :, :]
    m_ref[...] = jnp.max(jnp.maximum(me, mo), axis=-1,
                         keepdims=True).astype(m_ref.dtype)


def _pick_row_tile(n_rows, w2, target_rows=512):
    """Divisor t of n_rows (= b*h/2): ~target matmul rows per step, sublane-
    aligned output block, and >= 2 grid steps (megacore) when possible."""
    candidates = [t for t in range(1, n_rows + 1)
                  if n_rows % t == 0 and ((t * w2) % 8 == 0 or t == n_rows)]
    preferred = [t for t in candidates
                 if n_rows // t >= 2 and t * w2 <= max(target_rows, w2)]
    pool = preferred or candidates or [n_rows]
    return max(pool)


def patch_merge_pallas(feat_img, mask_img, gamma, beta, w_red,
                       *, eps=1e-5, row_tile=None, target_rows=512):
    """feat_img: (b, h, w, c) channel-last image; mask_img: (b, h, w, 1)."""
    b, h, w, c = feat_img.shape
    h2, w2 = h // 2, w // 2
    cout = w_red.shape[1]
    n_rows = b * h2
    if row_tile is None:
        row_tile = _pick_row_tile(n_rows, w2, target_rows)
    assert n_rows % row_tile == 0, "row_tile must divide b*h/2"

    # Free reshapes only: fold (batch, even/odd row) and the column pair.
    feat4 = feat_img.reshape(n_rows, 2, w2, 2 * c)
    mask4 = mask_img.reshape(n_rows, 2, w2, 2)

    # Permute LN affine + reduction weight rows into the kernel's channel order
    # ([even-col | odd-col] per row parity).  Parameter-sized, done once.
    g = gamma.reshape(4, c)
    bt = beta.reshape(4, c)
    gb = jnp.stack([jnp.concatenate([g[0], g[2]]),
                    jnp.concatenate([bt[0], bt[2]]),
                    jnp.concatenate([g[1], g[3]]),
                    jnp.concatenate([bt[1], bt[3]])], axis=0)        # (4, 2c)
    wr = w_red.reshape(4, c, cout)
    w_e = jnp.concatenate([wr[0], wr[2]], axis=0)                    # (2c, cout)
    w_o = jnp.concatenate([wr[1], wr[3]], axis=0)                    # (2c, cout)

    steps = n_rows // row_tile
    rows_total = n_rows * w2
    f_item = jnp.dtype(feat_img.dtype).itemsize
    m_item = jnp.dtype(mask_img.dtype).itemsize
    cost = pl.CostEstimate(
        flops=int(2 * rows_total * 4 * c * cout + 12 * rows_total * 4 * c),
        transcendentals=int(rows_total),
        bytes_accessed=int(feat4.size * f_item + mask4.size * m_item
                           + rows_total * cout * f_item + rows_total * m_item
                           + (gb.size + w_e.size + w_o.size) * 4),
    )

    kern = functools.partial(_patch_merge_kernel, eps=eps)
    x_out, m_out = pl.pallas_call(
        kern,
        out_shape=(jax.ShapeDtypeStruct((rows_total, cout), feat_img.dtype),
                   jax.ShapeDtypeStruct((n_rows, w2, 1), mask_img.dtype)),
        grid=(steps,),
        in_specs=[
            pl.BlockSpec((row_tile, 2, w2, 2 * c), lambda i: (i, 0, 0, 0)),
            pl.BlockSpec((row_tile, 2, w2, 2), lambda i: (i, 0, 0, 0)),
            pl.BlockSpec((4, 2 * c), lambda i: (0, 0)),
            pl.BlockSpec((2 * c, cout), lambda i: (0, 0)),
            pl.BlockSpec((2 * c, cout), lambda i: (0, 0)),
        ],
        out_specs=(
            pl.BlockSpec((row_tile * w2, cout), lambda i: (i, 0)),
            pl.BlockSpec((row_tile, w2, 1), lambda i: (i, 0, 0)),
        ),
        compiler_params=pltpu.CompilerParams(dimension_semantics=("parallel",)),
        cost_estimate=cost,
    )(feat4, mask4, gb, w_e, w_o)

    return (x_out.reshape(b, h2 * w2, cout),
            m_out.reshape(b, h2 * w2, 1))


# ------------------------------ host-side pieces ------------------------------
def points2img(pos, vals, h, w):
    """Scatter (b, n, c) point features into a dense (b, h, w, c) image."""
    b, n, c = vals.shape
    flat = (pos[:, :, 1].astype(jnp.int32) * w
            + pos[:, :, 0].astype(jnp.int32))                        # (b, n)
    img = jnp.zeros((b, h * w, c), vals.dtype)
    img = img.at[jnp.arange(b)[:, None], flat].set(vals)
    return img.reshape(b, h, w, c)


def _grid_hw(pos):
    # Mirrors the .item() host sync in the PyTorch module (shapes must be static).
    max_x = float(jax.device_get(jnp.max(pos[:, :, 0]))) + 1.0
    max_y = float(jax.device_get(jnp.max(pos[:, :, 1]))) + 1.0
    h = int(math.ceil(max_y / 2.0) * 2)
    w = int(math.ceil(max_x / 2.0) * 2)
    return h, w


def patch_merging_forward(params, pos, feat, mask=None):
    """pos: (b,n,2), feat: (b,n,c), mask: (b,n,1) -> (pos', feat', mask')."""
    b, n, c = feat.shape
    assert c == params["dim"], "dim does not accord to input"
    h, w = _grid_hw(pos)
    h2, w2 = h // 2, w // 2

    # Masking the points before scattering == masking the scattered image.
    feat_pts = feat * mask if mask is not None else feat
    feat_img = points2img(pos, feat_pts, h, w)                       # (b, h, w, c)
    if mask is not None:
        mask_img = points2img(pos, mask.astype(feat.dtype), h, w)    # (b, h, w, 1)
    else:
        mask_img = jnp.ones((b, h, w, 1), feat.dtype)

    x, mask_out = patch_merge_pallas(feat_img, mask_img, params["gamma"],
                                     params["beta"], params["w_red"])

    ys, xs = jnp.meshgrid(jnp.arange(h2, dtype=feat.dtype),
                          jnp.arange(w2, dtype=feat.dtype), indexing="ij")
    pos_out = jnp.broadcast_to(
        jnp.stack([xs, ys], axis=-1).reshape(1, h2 * w2, 2), (b, h2 * w2, 2))
    if mask is None:
        mask_out = None
    return pos_out, x, mask_out


# ------------------------------ pure-JAX reference ----------------------------
def reference_forward(params, pos, feat, mask=None):
    b, n, c = feat.shape
    h, w = _grid_hw(pos)
    h2, w2 = h // 2, w // 2
    feat_img = points2img(pos, feat, h, w)
    mask_img = None
    if mask is not None:
        mask_img = points2img(pos, mask.astype(feat.dtype), h, w)
        feat_img = feat_img * mask_img
    x0 = feat_img[:, 0::2, 0::2, :]
    x1 = feat_img[:, 1::2, 0::2, :]
    x2 = feat_img[:, 0::2, 1::2, :]
    x3 = feat_img[:, 1::2, 1::2, :]
    xc = jnp.concatenate([x0, x1, x2, x3], axis=-1)                  # (b,h2,w2,4c)
    mu = jnp.mean(xc, axis=-1, keepdims=True)
    var = jnp.mean((xc - mu) ** 2, axis=-1, keepdims=True)
    xn = (xc - mu) / jnp.sqrt(var + 1e-5) * params["gamma"] + params["beta"]
    x = (xn @ params["w_red"]).reshape(b, h2 * w2, -1)
    ys, xs = jnp.meshgrid(jnp.arange(h2, dtype=feat.dtype),
                          jnp.arange(w2, dtype=feat.dtype), indexing="ij")
    pos_out = jnp.broadcast_to(
        jnp.stack([xs, ys], axis=-1).reshape(1, h2 * w2, 2), (b, h2 * w2, 2))
    mask_out = None
    if mask is not None:
        mask_out = mask_img.reshape(b, h2, 2, w2, 2).max(axis=(2, 4)).reshape(
            b, h2 * w2, 1)
    return pos_out, x, mask_out


# ------------------------------------ main ------------------------------------
if __name__ == "__main__":
    b, c = 2, 32
    h_img, w_img = 16, 16
    root = jax.random.PRNGKey(0)
    kperm, kfeat, kmask, kg, kb, kw = jax.random.split(root, 6)

    # Distinct integer pixel coordinates per batch (a permutation of the grid).
    xs_g, ys_g = jnp.meshgrid(jnp.arange(w_img), jnp.arange(h_img), indexing="xy")
    coords = jnp.stack([xs_g.reshape(-1), ys_g.reshape(-1)], axis=-1)   # (hw, 2)
    perms = jnp.stack([jax.random.permutation(k, coords.shape[0])
                       for k in jax.random.split(kperm, b)])
    pos = coords[perms].astype(jnp.float32)                             # (b, n, 2)
    n = pos.shape[1]

    feat = jax.random.normal(kfeat, (b, n, c), jnp.float32)
    mask = (jax.random.uniform(kmask, (b, n, 1)) > 0.2).astype(jnp.float32)

    params = {
        "dim": c,
        # LayerNorm(4c) affine + Linear(4c, 2c, bias=False), stored as (4c, 2c).
        "gamma": 1.0 + 0.1 * jax.random.normal(kg, (4 * c,), jnp.float32),
        "beta": 0.1 * jax.random.normal(kb, (4 * c,), jnp.float32),
        "w_red": jax.random.normal(kw, (4 * c, 2 * c), jnp.float32)
                 / math.sqrt(4 * c),
    }

    pos_out, x_out, mask_out = patch_merging_forward(params, pos, feat, mask)
    x_out = jax.block_until_ready(x_out)

    h2, w2 = h_img // 2, w_img // 2
    assert pos_out.shape == (b, h2 * w2, 2)
    assert x_out.shape == (b, h2 * w2, 2 * c)
    assert mask_out.shape == (b, h2 * w2, 1)

    pos_exp, x_exp, mask_exp = reference_forward(params, pos, feat, mask)
    x_exp = jax.block_until_ready(x_exp)
    assert jnp.allclose(pos_out, pos_exp), "pos mismatch"
    assert jnp.allclose(mask_out, mask_exp, atol=1e-6), "mask mismatch"
    max_err = jnp.max(jnp.abs(x_out - x_exp))
    assert jnp.allclose(x_out, x_exp, rtol=2e-3, atol=2e-3), \
        f"max abs err {max_err}"

    print("KERNEL_OK")
</pallas_src>

<mosaic_0001>
module attributes {stable_mosaic.version = 11 : i64} {
  func.func @_patch_merge_kernel(%arg0: i32, %arg1: memref<8x2x8x64xf32, #tpu.memory_space<vmem>>, %arg2: memref<8x2x8x2xf32, #tpu.memory_space<vmem>>, %arg3: memref<4x64xf32, #tpu.memory_space<vmem>>, %arg4: memref<64x64xf32, #tpu.memory_space<vmem>>, %arg5: memref<64x64xf32, #tpu.memory_space<vmem>>, %arg6: memref<64x64xf32, #tpu.memory_space<vmem>>, %arg7: memref<8x8x1xf32, #tpu.memory_space<vmem>>) attributes {dimension_semantics = [#tpu.dimension_semantics<parallel>], iteration_bounds = array<i64: 2>, scalar_prefetch = 0 : i64, scratch_operands = 0 : i64, tpu.core_type = #tpu.core_type<tc>, window_params = [{transform_indices = @transform_0, window_bounds = array<i64: 8, 2, 8, 64>}, {transform_indices = @transform_1, window_bounds = array<i64: 8, 2, 8, 2>}, {pipeline_mode = #tpu.pipeline_mode<synchronous>, transform_indices = @transform_2, window_bounds = array<i64: 4, 64>}, {pipeline_mode = #tpu.pipeline_mode<synchronous>, transform_indices = @transform_3, window_bounds = array<i64: 64, 64>}, {pipeline_mode = #tpu.pipeline_mode<synchronous>, transform_indices = @transform_4, window_bounds = array<i64: 64, 64>}, {transform_indices = @transform_5, window_bounds = array<i64: 64, 64>}, {transform_indices = @transform_6, window_bounds = array<i64: 8, 8, 1>}]} {
    %c0 = arith.constant 0 : index
    %c0_0 = arith.constant 0 : index
    %c0_1 = arith.constant 0 : index
    %c0_2 = arith.constant 0 : index
    %0 = vector.load %arg1[%c0, %c0_0, %c0_1, %c0_2] : memref<8x2x8x64xf32, #tpu.memory_space<vmem>>, vector<8x1x8x64xf32>
    %1 = vector.shape_cast %0 : vector<8x1x8x64xf32> to vector<8x8x64xf32>
    %c0_3 = arith.constant 0 : index
    %c1 = arith.constant 1 : index
    %c0_4 = arith.constant 0 : index
    %c0_5 = arith.constant 0 : index
    %2 = vector.load %arg1[%c0_3, %c1, %c0_4, %c0_5] : memref<8x2x8x64xf32, #tpu.memory_space<vmem>>, vector<8x1x8x64xf32>
    %3 = vector.shape_cast %2 : vector<8x1x8x64xf32> to vector<8x8x64xf32>
    %cst = arith.constant dense<0.000000e+00> : vector<8x8xf32>
    %4 = vector.multi_reduction <add>, %1, %cst [2] : vector<8x8x64xf32> to vector<8x8xf32>
    %5 = vector.shape_cast %4 : vector<8x8xf32> to vector<8x8x1xf32>
    %cst_6 = arith.constant dense<0.000000e+00> : vector<8x8xf32>
    %6 = vector.multi_reduction <add>, %3, %cst_6 [2] : vector<8x8x64xf32> to vector<8x8xf32>
    %7 = vector.shape_cast %6 : vector<8x8xf32> to vector<8x8x1xf32>
    %8 = arith.addf %5, %7 : vector<8x8x1xf32>
    %9 = arith.mulf %1, %1 : vector<8x8x64xf32>
    %cst_7 = arith.constant dense<0.000000e+00> : vector<8x8xf32>
    %10 = vector.multi_reduction <add>, %9, %cst_7 [2] : vector<8x8x64xf32> to vector<8x8xf32>
    %11 = vector.shape_cast %10 : vector<8x8xf32> to vector<8x8x1xf32>
    %12 = arith.mulf %3, %3 : vector<8x8x64xf32>
    %cst_8 = arith.constant dense<0.000000e+00> : vector<8x8xf32>
    %13 = vector.multi_reduction <add>, %12, %cst_8 [2] : vector<8x8x64xf32> to vector<8x8xf32>
    %14 = vector.shape_cast %13 : vector<8x8xf32> to vector<8x8x1xf32>
    %15 = arith.addf %11, %14 : vector<8x8x1xf32>
    %cst_9 = arith.constant 7.812500e-03 : f32
    %16 = vector.broadcast %cst_9 : f32 to vector<8x8x1xf32>
    %17 = arith.mulf %8, %16 : vector<8x8x1xf32>
    %cst_10 = arith.constant 7.812500e-03 : f32
    %18 = vector.broadcast %cst_10 : f32 to vector<8x8x1xf32>
    %19 = arith.mulf %15, %18 : vector<8x8x1xf32>
    %20 = arith.mulf %17, %17 : vector<8x8x1xf32>
    %21 = arith.subf %19, %20 : vector<8x8x1xf32>
    %cst_11 = arith.constant 9.99999974E-6 : f32
    %22 = vector.broadcast %cst_11 : f32 to vector<8x8x1xf32>
    %23 = arith.addf %21, %22 : vector<8x8x1xf32>
    %24 = math.rsqrt %23 : vector<8x8x1xf32>
    %c0_12 = arith.constant 0 : index
    %c0_13 = arith.constant 0 : index
    %25 = vector.load %arg3[%c0_12, %c0_13] : memref<4x64xf32, #tpu.memory_space<vmem>>, vector<1x64xf32>
    %c1_14 = arith.constant 1 : index
    %c0_15 = arith.constant 0 : index
    %26 = vector.load %arg3[%c1_14, %c0_15] : memref<4x64xf32, #tpu.memory_space<vmem>>, vector<1x64xf32>
    %c2 = arith.constant 2 : index
    %c0_16 = arith.constant 0 : index
    %27 = vector.load %arg3[%c2, %c0_16] : memref<4x64xf32, #tpu.memory_space<vmem>>, vector<1x64xf32>
    %c3 = arith.constant 3 : index
    %c0_17 = arith.constant 0 : index
    %28 = vector.load %arg3[%c3, %c0_17] : memref<4x64xf32, #tpu.memory_space<vmem>>, vector<1x64xf32>
    %29 = vector.broadcast %17 : vector<8x8x1xf32> to vector<8x8x64xf32>
    %30 = arith.subf %1, %29 : vector<8x8x64xf32>
    %31 = vector.broadcast %24 : vector<8x8x1xf32> to vector<8x8x64xf32>
    %32 = arith.mulf %30, %31 : vector<8x8x64xf32>
    %33 = vector.shape_cast %25 : vector<1x64xf32> to vector<1x1x64xf32>
    %34 = vector.broadcast %33 : vector<1x1x64xf32> to vector<8x8x64xf32>
    %35 = arith.mulf %32, %34 : vector<8x8x64xf32>
    %36 = vector.shape_cast %26 : vector<1x64xf32> to vector<1x1x64xf32>
    %37 = vector.broadcast %36 : vector<1x1x64xf32> to vector<8x8x64xf32>
    %38 = arith.addf %35, %37 : vector<8x8x64xf32>
    %39 = vector.broadcast %17 : vector<8x8x1xf32> to vector<8x8x64xf32>
    %40 = arith.subf %3, %39 : vector<8x8x64xf32>
    %41 = vector.broadcast %24 : vector<8x8x1xf32> to vector<8x8x64xf32>
    %42 = arith.mulf %40, %41 : vector<8x8x64xf32>
    %43 = vector.shape_cast %27 : vector<1x64xf32> to vector<1x1x64xf32>
    %44 = vector.broadcast %43 : vector<1x1x64xf32> to vector<8x8x64xf32>
    %45 = arith.mulf %42, %44 : vector<8x8x64xf32>
    %46 = vector.shape_cast %28 : vector<1x64xf32> to vector<1x1x64xf32>
    %47 = vector.broadcast %46 : vector<1x1x64xf32> to vector<8x8x64xf32>
    %48 = arith.addf %45, %47 : vector<8x8x64xf32>
    %49 = vector.shape_cast %38 : vector<8x8x64xf32> to vector<64x64xf32>
    %c0_18 = arith.constant 0 : index
    %c0_19 = arith.constant 0 : index
    %50 = vector.load %arg4[%c0_18, %c0_19] : memref<64x64xf32, #tpu.memory_space<vmem>>, vector<64x64xf32>
    %cst_20 = arith.constant dense<0.000000e+00> : vector<64x64xf32>
    %51 = tpu.matmul %49, %50, %cst_20 {dimension_numbers = #tpu.dot_dimension_numbers<[1], [0], [0], [1], [0, 0, 1, 1], [], []>} : vector<64x64xf32>, vector<64x64xf32>, vector<64x64xf32> -> vector<64x64xf32>
    %52 = vector.shape_cast %48 : vector<8x8x64xf32> to vector<64x64xf32>
    %c0_21 = arith.constant 0 : index
    %c0_22 = arith.constant 0 : index
    %53 = vector.load %arg5[%c0_21, %c0_22] : memref<64x64xf32, #tpu.memory_space<vmem>>, vector<64x64xf32>
    %cst_23 = arith.constant dense<0.000000e+00> : vector<64x64xf32>
    %54 = tpu.matmul %52, %53, %cst_23 {dimension_numbers = #tpu.dot_dimension_numbers<[1], [0], [0], [1], [0, 0, 1, 1], [], []>} : vector<64x64xf32>, vector<64x64xf32>, vector<64x64xf32> -> vector<64x64xf32>
    %55 = arith.addf %51, %54 : vector<64x64xf32>
    %c0_24 = arith.constant 0 : index
    %c0_25 = arith.constant 0 : index
    %56 = vector.load %arg6[%c0_24, %c0_25] : memref<64x64xf32, #tpu.memory_space<vmem>>, vector<64x64xf32>
    tpu.vector_store %arg6[%c0_24, %c0_25], %55 {strides = array<i32>} : memref<64x64xf32, #tpu.memory_space<vmem>>, vector<64x64xf32>,
    %c0_26 = arith.constant 0 : index
    %c0_27 = arith.constant 0 : index
    %c0_28 = arith.constant 0 : index
    %c0_29 = arith.constant 0 : index
    %57 = vector.load %arg2[%c0_26, %c0_27, %c0_28, %c0_29] : memref<8x2x8x2xf32, #tpu.memory_space<vmem>>, vector<8x1x8x2xf32>
    %58 = vector.shape_cast %57 : vector<8x1x8x2xf32> to vector<8x8x2xf32>
    %c0_30 = arith.constant 0 : index
    %c1_31 = arith.constant 1 : index
    %c0_32 = arith.constant 0 : index
    %c0_33 = arith.constant 0 : index
    %59 = vector.load %arg2[%c0_30, %c1_31, %c0_32, %c0_33] : memref<8x2x8x2xf32, #tpu.memory_space<vmem>>, vector<8x1x8x2xf32>
    %60 = vector.shape_cast %59 : vector<8x1x8x2xf32> to vector<8x8x2xf32>
    %61 = arith.maximumf %58, %60 : vector<8x8x2xf32>
    %cst_34 = arith.constant dense<0xFF800000> : vector<8x8xf32>
    %62 = vector.multi_reduction <maximumf>, %61, %cst_34 [2] : vector<8x8x2xf32> to vector<8x8xf32>
    %63 = vector.shape_cast %62 : vector<8x8xf32> to vector<8x8x1xf32>
    %c0_35 = arith.constant 0 : index
    %c0_36 = arith.constant 0 : index
    %c0_37 = arith.constant 0 : index
    %64 = vector.load %arg7[%c0_35, %c0_36, %c0_37] : memref<8x8x1xf32, #tpu.memory_space<vmem>>, vector<8x8x1xf32>
    tpu.vector_store %arg7[%c0_35, %c0_36, %c0_37], %63 {strides = array<i32>} : memref<8x8x1xf32, #tpu.memory_space<vmem>>, vector<8x8x1xf32>,
    return
  }
  func.func @transform_0(%arg0: i32) -> (i32, i32, i32, i32) {
    %c0_i32 = arith.constant 0 : i32
    %c0_i32_0 = arith.constant 0 : i32
    %c0_i32_1 = arith.constant 0 : i32
    %c0_i32_2 = arith.constant 0 : i32
    return %arg0, %c0_i32, %c0_i32_0, %c0_i32_1 : i32, i32, i32, i32
  }
  func.func @transform_1(%arg0: i32) -> (i32, i32, i32, i32) {
    %c0_i32 = arith.constant 0 : i32
    %c0_i32_0 = arith.constant 0 : i32
    %c0_i32_1 = arith.constant 0 : i32
    %c0_i32_2 = arith.constant 0 : i32
    return %arg0, %c0_i32, %c0_i32_0, %c0_i32_1 : i32, i32, i32, i32
  }
  func.func @transform_2(%arg0: i32) -> (i32, i32) {
    %c0_i32 = arith.constant 0 : i32
    %c0_i32_0 = arith.constant 0 : i32
    %c0_i32_1 = arith.constant 0 : i32
    return %c0_i32, %c0_i32_0 : i32, i32
  }
  func.func @transform_3(%arg0: i32) -> (i32, i32) {
    %c0_i32 = arith.constant 0 : i32
    %c0_i32_0 = arith.constant 0 : i32
    %c0_i32_1 = arith.constant 0 : i32
    return %c0_i32, %c0_i32_0 : i32, i32
  }
  func.func @transform_4(%arg0: i32) -> (i32, i32) {
    %c0_i32 = arith.constant 0 : i32
    %c0_i32_0 = arith.constant 0 : i32
    %c0_i32_1 = arith.constant 0 : i32
    return %c0_i32, %c0_i32_0 : i32, i32
  }
  func.func @transform_5(%arg0: i32) -> (i32, i32) {
    %c0_i32 = arith.constant 0 : i32
    %c0_i32_0 = arith.constant 0 : i32
    return %arg0, %c0_i32 : i32, i32
  }
  func.func @transform_6(%arg0: i32) -> (i32, i32, i32) {
    %c0_i32 = arith.constant 0 : i32
    %c0_i32_0 = arith.constant 0 : i32
    %c0_i32_1 = arith.constant 0 : i32
    return %arg0, %c0_i32, %c0_i32_0 : i32, i32, i32
  }
}

</mosaic_0001>

<bundles_post_ra>
// kernel: tpu_custom_call.1
= control target key start
LH: loop header
LB: loop body
LE: loop exit
PB: predicated region body
PF: predicated region fallthrough
CT: control target
= control target key end

     0   :  { %12 = vsyncpa [#allocation3], 0  ;;  %s1791_s0 = inlined_call_operand.vmem [shape: f32[16,2,8,64], index: 0, kind: input, shape index: {}]   ;;  %s1792_s1 = inlined_call_operand.vmem [shape: f32[16,2,8,2], index: 1, kind: input, shape index: {}]   ;;  %s1793_s2 = inlined_call_operand.vmem [shape: f32[4,64], index: 2, kind: input, shape index: {}]   ;;  %s1794_s3 = inlined_call_operand.hbm [shape: f32[64,64], index: 3, kind: input, shape index: {}]   ;;  %s1795_s4 = inlined_call_operand.hbm [shape: f32[64,64], index: 4, kind: input, shape index: {}]   ;;  %s1796_s5 = inlined_call_operand.vmem [shape: f32[128,64], index: 5, kind: output, shape index: {0}]   ;;  %s1797_s6 = inlined_call_operand.vmem [shape: f32[16,8,1], index: 6, kind: output, shape index: {1}]  }
   0x1   :  { %13 = vsyncpa [#allocation5], 0  ;;  %s1415_s21 = smov 0  }
   0x2 LB: > { %s1070_s22 = sadd.s32 4294967295, %s1374_s21   ;;  %p1072_p0 = scmp.ge.s32.totalorder %s1374_s21, 1  ;;  %s1374_s21 = sphi %s1415_s21, %s19_s21  }
   0x3   : > { %p191_p1 = scmp.lt.s32.totalorder %s1374_s21, 3  ;;  %s1376_s23 = smov [#allocation2]  }
   0x4   : > { %s206_s24 = sshll.u32 %s1376_s23, 4  ;;  %p1429_p3 = scmp.eq.s32.totalorder %s1070_s22, 0  ;;  %s207_s24 = int_to_ptr.vmem [resolvable:$true] %s206_s24 }
   0x5   : > { %p1423_p2 = pnand %p1072_p0, %p191_p1  ;;  %s1377_s27 = smov [#allocation4]  }
   0x6   : > { %s1802_s26 = scalar_select %p1429_p3, 1, 0 }
   0x7   : > { %s1801_s25 = scalar_select %p1423_p2, 1, 0 }
   0x8   : > { %p1265_p4 = pneg %p1423_p2  ;;  %s219_s28 = sshll.u32 %s1377_s27, 4  ;;  %s1441_s28 = int_to_ptr.vmem [resolvable:$true] %s219_s28 }
   0x9   : > { %s1304_s8 = scalar_lea.hbm %s1794_s3, 1024 }
   0xa   : > { %p1437_p5 = pnand %p1429_p3, %p1265_p4  ;;  %p1305_p6 = scmp.ne.s32.totalorder %s1794_s3, %s1304_s8 }
   0xb   : > { %p1311_p10 = scmp.lt.u32.totalorder %s1304_s8, %s1794_s3 }
   0xc   : > { %p1306_p7 = pneg %p1437_p5 }
   0xe   : > { %p1307_p8 = pnand %p1306_p7, %p1305_p6 }
  0x10   : > { %p1308_p9 = pneg %p1307_p8 }
  0x12   : > { %p1313_p11 = pnand %p1311_p10, %p1308_p9 }
  0x14   : > { %1316 = shalt.err (!%p1313_p11)
}
  0x15   : > { %s1317_s13 = scalar_lea.vmem %s207_s24, 1024  ;;  %p1325_p1 = scmp.lt.s32.totalorder %s207_s24, %s207_s24 }
  0x16   : > { %p1318_p12 = scmp.ne.s32.totalorder %s207_s24, %s1317_s13  ;;  %p1326_p4 = scmp.lt.s32.totalorder %s1317_s13, %s1317_s13 }
  0x18   : > { %p1320_p13 = pnand %p1318_p12, %p1306_p7  ;;  %p1327_p3 = por %p1326_p4, %p1325_p1 }
  0x1a   : > { %p1321_p0 = pneg %p1320_p13 }
  0x1c   : > { %p1328_p2 = pnand %p1327_p3, %p1321_p0 }
  0x1e   : > { %1331 = shalt.err (!%p1328_p2)
}
  0x1f   : > { %s1378_s14 = smov 128   ;;  %s1379_s15 = smov 8  }
  0x20   : > { %1268 = dma.hbm_to_vmem [thread:$0]  (!%p1437_p5), %s1794_s3, 1024, %s207_s24, [#allocation3], %s1378_s14, %s1378_s14, %s1379_s15  }
  0x21   : > { %s1332_s20 = scalar_lea.hbm %s1795_s4, 1024 }
  0x22   : > { %p1333_p6 = scmp.ne.s32.totalorder %s1795_s4, %s1332_s20  ;;  %p1339_p8 = scmp.lt.u32.totalorder %s1332_s20, %s1795_s4 }
  0x24   : > { %p1335_p2 = pnand %p1333_p6, %p1306_p7 }
  0x26   : > { %p1336_p3 = pneg %p1335_p2 }
  0x28   : > { %p1341_p9 = pnand %p1339_p8, %p1336_p3 }
  0x2a   : > { %1344 = shalt.err (!%p1341_p9)
}
  0x2b   : > { %s1345_s24 = scalar_lea.vmem %s1441_s28, 1024  ;;  %p1353_p13 = scmp.lt.s32.totalorder %s1441_s28, %s1441_s28 }
  0x2c   : > { %p1346_p10 = scmp.ne.s32.totalorder %s1441_s28, %s1345_s24  ;;  %p1354_p0 = scmp.lt.s32.totalorder %s1345_s24, %s1345_s24 }
  0x2e   : > { %p1348_p11 = pnand %p1346_p10, %p1306_p7  ;;  %p1355_p1 = por %p1354_p0, %p1353_p13 }
  0x30   : > { %p1349_p12 = pneg %p1348_p11 }
  0x32   : > { %p1356_p4 = pnand %p1355_p1, %p1349_p12 }
  0x34   : > { %1359 = shalt.err (!%p1356_p4)
}
  0x35   : > { %1271 = dma.hbm_to_vmem [thread:$0]  (!%p1437_p5), %s1795_s4, 1024, %s1441_s28, [#allocation5], %s1378_s14, %s1378_s14, %s1379_s15  }
  0x36   : > { %p1804_p6 = scmp.ne.s32.totalorder %s1801_s25, 0 }
  0x37   : > { %p1805_p2 = scmp.ne.s32.totalorder (!%p1804_p6), %s1802_s26, 0 }
  0x38   : > { %255 = sbr.rel (%p1804_p6) target bundleno = 517 (0x205), region = 40 }
  0x3f   : > { %1365 = dma.done.wait (%p1805_p2), [#allocation3], 1024  }
  0x40   : > { %1367 = vsyncadd (%p1805_p2), [#allocation3], 4294966272 }
  0x41   : > { %1369 = dma.done.wait (%p1805_p2), [#allocation5], 1024  }
  0x42   : > { %1371 = vsyncadd (%p1805_p2), [#allocation5], 4294966272  ;;  %s1079_s29 = sshll.u32 %s1070_s22, 3  ;;  %vm344_vm0 = vcmask 523264   ;;  %v613_v42 = vld [vmem:[#allocation4] sm:$0xff]  ;;  %v614_v43 = vld [vmem:[#allocation4 + $0x8] sm:$0xff] }
  0x43   : > { %p302_p7 = scmp.lt.s32.totalorder %s1079_s29, 15  ;;  %v605_v44 = vld [vmem:[#allocation2] sm:$0xff]  ;;  %v1217_v45 = vpack.c.bf16 %v614_v43, %v613_v42  ;;  %v606_v46 = vld [vmem:[#allocation2 + $0x8] sm:$0xff]  ;;  %v615_v52 = vld [vmem:[#allocation4 + $0x10] sm:$0xff]  ;;  %vm912_vm1 = vcmask 15360   ;;  %vm937_vm2 = vcmask 7168  }
  0x44   : > { %v1233_v47 = vpack.c.bf16 %v606_v46, %v605_v44  ;;  %v616_v53 = vld [vmem:[#allocation4 + $0x18] sm:$0xff]  ;;  %v607_v54 = vld [vmem:[#allocation2 + $0x10] sm:$0xff]  ;;  %v617_v60 = vld [vmem:[#allocation4 + $0x20] sm:$0xff] }
  0x45   : > { %s1807_s29 = smov (!%p302_p7, %s1079_s29), 15  ;;  %1218 = vmatprep.subr.bf16.mxu1 %v1217_v45  ;;  %v1221_v55 = vpack.c.bf16 %v616_v53, %v615_v52  ;;  %v608_v56 = vld [vmem:[#allocation2 + $0x18] sm:$0xff]  ;;  %v618_v61 = vld [vmem:[#allocation4 + $0x28] sm:$0xff]  ;;  %v609_v62 = vld [vmem:[#allocation2 + $0x20] sm:$0xff] }
  0x46   : > { %s1127_s25 = sshll.u32 %s1807_s29, 4  ;;  %1234 = vmatprep.subr.bf16.mxu0 %v1233_v47  ;;  %1220 = vmatpush3.bf16.msra.mxu1 %v1217_v45  ;;  %v1237_v57 = vpack.c.bf16 %v608_v56, %v607_v54  ;;  %s1086_s23 = sshll.u32 %s1807_s29, 3 }
  0x47   : > { %s1510_s11 = scalar_lea.vmem %s1791_s0, %s1127_s25  ;;  %1236 = vmatpush3.bf16.msra.mxu0 %v1233_v47  ;;  %1222 = vmatprep.subr.bf16.mxu1 %v1221_v55  ;;  %s313_s12 = scalar_lea.vmem %s1792_s1, %s1127_s25 }
  0x48   : > { %v1513_v0 = vld [vmem:[%s1510_s11 + $0x10] sm:$0xff]  ;;  %v1516_v1 = vld [vmem:[%s1510_s11] sm:$0xff]  ;;  %v1519_v2 = vld [vmem:[%s1510_s11 + $0x18] sm:$0xff]  ;;  %1238 = vmatprep.subr.bf16.mxu0 %v1237_v57  ;;  %s325_s7 = scalar_lea.vmem %s1797_s6, %s1086_s23  ;;  %s1770_s9 = scalar_lea.vmem %s1796_s5, %s1086_s23 }
  0x49   : > { %v348_v3 = vsel %vm344_vm0, %v1513_v0, 0.0  ;;  %v345_v4 = vsel %vm344_vm0, %v1516_v1, 0.0  ;;  %v1526_v5 = vld [vmem:[%s1510_s11 + $0x8] sm:$0xff]  ;;  %v372_v6 = vsel %vm344_vm0, %v1519_v2, 0.0  ;;  %v401_v9 = vmul.f32 %v1516_v1, %v1516_v1  ;;  %v1548_v17 = vld [vmem:[%s1510_s11 + $0x20] sm:$0xff]  ;;  %v1555_v20 = vld [vmem:[%s1510_s11 + $0x38] sm:$0xff] }
  0x4a   : > { %349 = vadd.xlane.f32.xlu1 %v348_v3  ;;  %346 = vadd.xlane.f32.xlu0 %v345_v4  ;;  %v369_v7 = vsel %vm344_vm0, %v1526_v5, 0.0  ;;  %v433_v8 = vmul.f32 %v1526_v5, %v1526_v5  ;;  %v434_v12 = vmul.f32 %v1519_v2, %v1519_v2  ;;  %v402_v13 = vmul.f32 %v1513_v0, %v1513_v0  ;;  %v1545_v16 = vld [vmem:[%s1510_s11 + $0x28] sm:$0xff]  ;;  %v1558_v21 = vld [vmem:[%s1510_s11 + $0x30] sm:$0xff]  ;;  %v1580_v33 = vld [vmem:[%s1510_s11 + $0x40] sm:$0xff] }
  0x4b   : > { %v409_v11 = vsel %vm344_vm0, %v401_v9, 0.0  ;;  %v375_v18 = vsel %vm344_vm0, %v1545_v16, 0.0  ;;  %v351_v19 = vsel %vm344_vm0, %v1548_v17, 0.0  ;;  %v378_v22 = vsel %vm344_vm0, %v1555_v20, 0.0  ;;  %v1577_v32 = vld [vmem:[%s1510_s11 + $0x48] sm:$0xff]  ;;  %v1587_v36 = vld [vmem:[%s1510_s11 + $0x58] sm:$0xff]  ;;  %1224 = vmatpush3.bf16.msra.mxu1 %v1221_v55  ;;  %1240 = vmatpush3.bf16.msra.mxu0 %v1237_v57 }
  0x4c   : > { %v441_v10 = vsel %vm344_vm0, %v433_v8, 0.0  ;;  %v444_v14 = vsel %vm344_vm0, %v434_v12, 0.0  ;;  %v412_v15 = vsel %vm344_vm0, %v402_v13, 0.0  ;;  %v354_v23 = vsel %vm344_vm0, %v1558_v21, 0.0  ;;  %v1590_v37 = vld [vmem:[%s1510_s11 + $0x50] sm:$0xff]  ;;  %v1609_v63 = vld [vmem:[%s1510_s11 + $0x68] sm:$0xff] }
  0x4d   : > { %v435_v24 = vmul.f32 %v1545_v16, %v1545_v16  ;;  %v403_v25 = vmul.f32 %v1548_v17, %v1548_v17  ;;  %v436_v28 = vmul.f32 %v1555_v20, %v1555_v20  ;;  %v404_v29 = vmul.f32 %v1558_v21, %v1558_v21  ;;  %v1612_v3 = vld [vmem:[%s1510_s11 + $0x60] sm:$0xff]  ;;  %v620_v12 = vld [vmem:[#allocation4 + $0x38] sm:$0xff]  ;;  %v1622_v13 = vld [vmem:[%s1510_s11 + $0x70] sm:$0xff] }
  0x4e   : > { %373 = vadd.xlane.f32.xlu1 %v372_v6  ;;  %370 = vadd.xlane.f32.xlu0 %v369_v7  ;;  %v381_v34 = vsel %vm344_vm0, %v1577_v32, 0.0  ;;  %v357_v35 = vsel %vm344_vm0, %v1580_v33, 0.0  ;;  %v384_v38 = vsel %vm344_vm0, %v1587_v36, 0.0  ;;  %v360_v39 = vsel %vm344_vm0, %v1590_v37, 0.0  ;;  %v610_v6 = vld [vmem:[#allocation2 + $0x28] sm:$0xff]  ;;  %v1120_v42 = vld [vmem:[%s313_s12 + $0x38] sm:$0xff] }
  0x4f   : > { %v447_v26 = vsel %vm344_vm0, %v435_v24, 0.0  ;;  %v415_v27 = vsel %vm344_vm0, %v403_v25, 0.0  ;;  %v450_v30 = vsel %vm344_vm0, %v436_v28, 0.0  ;;  %v418_v31 = vsel %vm344_vm0, %v404_v29, 0.0  ;;  %v889_v45 = vld [vmem:[%s313_s12 + $0x20] sm:$0xff]  ;;  %v1119_v46 = vld [vmem:[%s313_s12 + $0x28] sm:$0xff] }
  0x50   : > { %v437_v40 = vmul.f32 %v1577_v32, %v1577_v32  ;;  %v405_v41 = vmul.f32 %v1580_v33, %v1580_v33  ;;  %v438_v50 = vmul.f32 %v1587_v36, %v1587_v36  ;;  %v406_v51 = vmul.f32 %v1590_v37, %v1590_v37  ;;  %v892_v47 = vld [vmem:[%s313_s12 + $0x50] sm:$0xff]  ;;  %v1121_v52 = vld [vmem:[%s313_s12 + $0x48] sm:$0xff] }
  0x51   : > { %v1225_v4 = vpack.c.bf16 %v618_v61, %v617_v60  ;;  %v1241_v7 = vpack.c.bf16 %v610_v6, %v609_v62  ;;  %v387_v8 = vsel %vm344_vm0, %v1609_v63, 0.0  ;;  %v363_v9 = vsel %vm344_vm0, %v1612_v3, 0.0  ;;  %v893_v60 = vld [vmem:[%s313_s12 + $0x60] sm:$0xff]  ;;  %v1123_v61 = vld [vmem:[%s313_s12 + $0x68] sm:$0xff] }
  0x52   : > { %442 = vadd.xlane.f32.xlu1 %v441_v10  ;;  %410 = vadd.xlane.f32.xlu0 %v409_v11  ;;  %v453_v48 = vsel %vm344_vm0, %v437_v40, 0.0  ;;  %v421_v49 = vsel %vm344_vm0, %v405_v41, 0.0  ;;  %v456_v58 = vsel %vm344_vm0, %v438_v50, 0.0  ;;  %v424_v59 = vsel %vm344_vm0, %v406_v51, 0.0  ;;  %v1619_v10 = vld [vmem:[%s1510_s11 + $0x78] sm:$0xff]  ;;  %v619_v11 = vld [vmem:[#allocation4 + $0x30] sm:$0xff] }
  0x53   : > { %1226 = vmatprep.subr.bf16.mxu1 %v1225_v4  ;;  %1242 = vmatprep.subr.bf16.mxu0 %v1241_v7  ;;  %v439_v24 = vmul.f32 %v1609_v63, %v1609_v63  ;;  %v407_v25 = vmul.f32 %v1612_v3, %v1612_v3  ;;  %v440_v28 = vmul.f32 %v1619_v10, %v1619_v10  ;;  %v1117_v40 = vld [vmem:[%s313_s12 + $0x8] sm:$0xff]  ;;  %v890_v41 = vld [vmem:[%s313_s12 + $0x30] sm:$0xff]  ;;  %v1122_v50 = vld [vmem:[%s313_s12 + $0x58] sm:$0xff] }
  0x54   : > { %1228 = vmatpush3.bf16.msra.mxu1 %v1225_v4  ;;  %1244 = vmatpush3.bf16.msra.mxu0 %v1241_v7  ;;  %v408_v29 = vmul.f32 %v1622_v13, %v1622_v13  ;;  %v907_v44 = vmax.f32 %v890_v41, %v1120_v42  ;;  %v891_v51 = vld [vmem:[%s313_s12 + $0x40] sm:$0xff]  ;;  %v909_v55 = vmax.f32 %v892_v47, %v1122_v50 }
  0x55   : > { %v908_v57 = vmax.f32 %v891_v51, %v1121_v52  ;;  %v910_v7 = vmax.f32 %v893_v60, %v1123_v61  ;;  %v1664_v60 = vld [vmem:[%s1793_s2 + $0x2] ss:$0 sm:$0xff]  ;;  %v1669_v61 = vld [vmem:[%s1793_s2] ss:$0 sm:$0xff] }
  0x56   : > { %445 = vadd.xlane.f32.xlu1 %v444_v14  ;;  %413 = vadd.xlane.f32.xlu0 %v412_v15  ;;  %v1229_v14 = vpack.c.bf16 %v620_v12, %v619_v11  ;;  %v611_v15 = vld [vmem:[#allocation2 + $0x30] sm:$0xff]  ;;  %v922_v54 = vsel %vm912_vm1, %v907_v44, -inf  ;;  %v928_v62 = vsel %vm912_vm1, %v909_v55, -inf }
  0x57   : > { %v925_v6 = vsel %vm912_vm1, %v908_v57, -inf }
  0x58   : > { %1230 = vmatprep.subr.bf16.mxu1 %v1229_v14 }
  0x59   : > { %1232 = vmatpush3.bf16.msra.mxu1 %v1229_v14 }
  0x5a   : > { %376 = vadd.xlane.f32.xlu1 %v375_v18  ;;  %352 = vadd.xlane.f32.xlu0 %v351_v19  ;;  %v612_v18 = vld [vmem:[#allocation2 + $0x38] sm:$0xff] }
  0x5b   : > { %v1245_v19 = vpack.c.bf16 %v612_v18, %v611_v15 }
  0x5d   : > { %1246 = vmatprep.subr.bf16.mxu0 %v1245_v19 }
  0x5e   : > { %379 = vadd.xlane.f32.xlu1 %v378_v22  ;;  %355 = vadd.xlane.f32.xlu0 %v354_v23  ;;  %v390_v22 = vsel %vm344_vm0, %v1619_v10, 0.0  ;;  %v366_v23 = vsel %vm344_vm0, %v1622_v13, 0.0 }
  0x5f   : > { %1248 = vmatpush3.bf16.msra.mxu0 %v1245_v19 }
  0x62   : > { %448 = vadd.xlane.f32.xlu1 %v447_v26  ;;  %416 = vadd.xlane.f32.xlu0 %v415_v27  ;;  %v459_v26 = vsel %vm344_vm0, %v439_v24, 0.0  ;;  %v427_v27 = vsel %vm344_vm0, %v407_v25, 0.0 }
  0x66   : > { %451 = vadd.xlane.f32.xlu1 %v450_v30  ;;  %419 = vadd.xlane.f32.xlu0 %v418_v31  ;;  %v462_v30 = vsel %vm344_vm0, %v440_v28, 0.0  ;;  %v430_v31 = vsel %vm344_vm0, %v408_v29, 0.0 }
  0x6a   : > { %382 = vadd.xlane.f32.xlu1 %v381_v34  ;;  %358 = vadd.xlane.f32.xlu0 %v357_v35  ;;  %v888_v34 = vld [vmem:[%s313_s12 + $0x10] sm:$0xff]  ;;  %v1118_v35 = vld [vmem:[%s313_s12 + $0x18] sm:$0xff] }
  0x6e   : > { %385 = vadd.xlane.f32.xlu1 %v384_v38  ;;  %361 = vadd.xlane.f32.xlu0 %v360_v39  ;;  %v887_v38 = vld [vmem:[%s313_s12] sm:$0xff]  ;;  %v905_v39 = vmax.f32 %v888_v34, %v1118_v35 }
  0x6f   : > { %v904_v43 = vmax.f32 %v887_v38, %v1117_v40 }
  0x71   : > { %v913_v53 = vsel %vm912_vm1, %v904_v43, -inf }
  0x72   : > { %454 = vadd.xlane.f32.xlu1 %v453_v48  ;;  %422 = vadd.xlane.f32.xlu0 %v421_v49  ;;  %v916_v48 = vsel %vm912_vm1, %v905_v39, -inf  ;;  %v906_v49 = vmax.f32 %v889_v45, %v1119_v46 }
  0x74   : > { %v919_v56 = vsel %vm912_vm1, %v906_v49, -inf }
  0x76   : > { %457 = vadd.xlane.f32.xlu1 %v456_v58  ;;  %425 = vadd.xlane.f32.xlu0 %v424_v59  ;;  %v894_v58 = vld [vmem:[%s313_s12 + $0x70] sm:$0xff]  ;;  %v1124_v59 = vld [vmem:[%s313_s12 + $0x78] sm:$0xff] }
  0x77   : > { %v911_v4 = vmax.f32 %v894_v58, %v1124_v59 }
  0x7a   : > { %388 = vadd.xlane.f32.xlu1 %v387_v8  ;;  %364 = vadd.xlane.f32.xlu0 %v363_v9  ;;  %v934_v8 = vsel %vm912_vm1, %v911_v4, -inf  ;;  %v931_v9 = vsel %vm912_vm1, %v910_v7, -inf }
  0x7e   : > { %391 = vadd.xlane.f32.xlu1 %v390_v22  ;;  %367 = vadd.xlane.f32.xlu0 %v366_v23 }
  0x82   : > { %460 = vadd.xlane.f32.xlu1 %v459_v26  ;;  %428 = vadd.xlane.f32.xlu0 %v427_v27 }
  0x86   : > { %463 = vadd.xlane.f32.xlu1 %v462_v30  ;;  %431 = vadd.xlane.f32.xlu0 %v430_v31 }
  0x8a   : > { %917 = vmax.xlane.f32.xlu1 %v916_v48  ;;  %914 = vmax.xlane.f32.xlu0 %v913_v53 }
  0x8e   : > { %923 = vmax.xlane.f32.xlu1 %v922_v54  ;;  %920 = vmax.xlane.f32.xlu0 %v919_v56 }
  0x92   : > { %929 = vmax.xlane.f32.xlu1 %v928_v62  ;;  %926 = vmax.xlane.f32.xlu0 %v925_v6 }
  0x96   : > { %935 = vmax.xlane.f32.xlu1 %v934_v8  ;;  %932 = vmax.xlane.f32.xlu0 %v931_v9  ;;  %v1678_v9 = vld [vmem:[%s1793_s2 + $0x3] ss:$0 sm:$0xff] }
  0xd7   : > { %v350_v11 = vpop.xlane.xlu1 %349  ;;  %v347_v12 = vpop.xlane.xlu0 %346 }
  0xdb   : > { %v374_v14 = vpop.xlane.xlu1 %373  ;;  %v371_v15 = vpop.xlane.xlu0 %370 }
  0xdc   : > { %v393_v18 = vadd.f32 %v371_v15, %v347_v12  ;;  %v394_v19 = vadd.f32 %v374_v14, %v350_v11 }
  0xde   : > { %v473_v22 = vmul.f32 0.0078125, %v393_v18  ;;  %v474_v26 = vmul.f32 0.0078125, %v394_v19  ;;  %v1684_v18 = vld [vmem:[%s1793_s2 + $0x1] ss:$0 sm:$0xff] }
  0xdf   : > { %v443_v23 = vpop.xlane.xlu1 %442  ;;  %v411_v24 = vpop.xlane.xlu0 %410 }
  0xe0   : > { %v465_v25 = vadd.f32 %v443_v23, %v411_v24  ;;  %v489_v27 = vmul.f32 %v473_v22, %v473_v22  ;;  %v490_v35 = vmul.f32 %v474_v26, %v474_v26  ;;  %v525_v53 = vsub.f32 %v1516_v1, %v473_v22 }
  0xe1   : > { %v565_v54 = vsub.f32 %v1526_v5, %v473_v22  ;;  %v526_v6 = vsub.f32 %v1513_v0, %v474_v26  ;;  %v566_v7 = vsub.f32 %v1519_v2, %v474_v26 }
  0xe2   : > { %v481_v28 = vmul.f32 0.0078125, %v465_v25 }
  0xe3   : > { %v446_v29 = vpop.xlane.xlu1 %445  ;;  %v414_v30 = vpop.xlane.xlu0 %413 }
  0xe4   : > { %v466_v31 = vadd.f32 %v446_v29, %v414_v30  ;;  %v497_v34 = vsub.f32 %v481_v28, %v489_v27 }
  0xe6   : > { %v482_v38 = vmul.f32 0.0078125, %v466_v31  ;;  %v505_v39 = vadd.f32 1e-05, %v497_v34 }
  0xe7   : > { %v377_v40 = vpop.xlane.xlu1 %376  ;;  %v353_v41 = vpop.xlane.xlu0 %352 }
  0xe8   : > { %v498_v42 = vsub.f32 %v482_v38, %v490_v35  ;;  %1288 = vrsqrt.f32 %v505_v39  ;;  %v395_v44 = vadd.f32 %v377_v40, %v353_v41 }
  0xea   : > { %v506_v43 = vadd.f32 1e-05, %v498_v42  ;;  %v1653_v48 = vmul.f32 0.0078125, %v395_v44 }
  0xeb   : > { %v380_v45 = vpop.xlane.xlu1 %379  ;;  %v356_v46 = vpop.xlane.xlu0 %355 }
  0xec   : > { %1290 = vrsqrt.f32 %v506_v43  ;;  %v396_v47 = vadd.f32 %v380_v45, %v356_v46  ;;  %v491_v55 = vmul.f32 %v1653_v48, %v1653_v48  ;;  %v527_v44 = vsub.f32 %v1548_v17, %v1653_v48 }
  0xed   : > { %v567_v45 = vsub.f32 %v1545_v16, %v1653_v48 }
  0xee   : > { %v1655_v52 = vmul.f32 0.0078125, %v396_v47 }
  0xef   : > { %v449_v49 = vpop.xlane.xlu1 %448  ;;  %v417_v50 = vpop.xlane.xlu0 %416 }
  0xf0   : > { %v467_v51 = vadd.f32 %v449_v49, %v417_v50  ;;  %v492_v8 = vmul.f32 %v1655_v52, %v1655_v52  ;;  %v568_v17 = vsub.f32 %v1555_v20, %v1655_v52 }
  0xf2   : > { %v483_v56 = vmul.f32 0.0078125, %v467_v51  ;;  %v1289_v57 = vpop.eup %1288 }
  0xf3   : > { %v452_v58 = vpop.xlane.xlu1 %451  ;;  %v420_v59 = vpop.xlane.xlu0 %419  ;;  %v573_v5 = vmul.f32 %v1289_v57, %v565_v54  ;;  %v533_v4 = vmul.f32 %v1289_v57, %v525_v53 }
  0xf4   : > { %v499_v1 = vsub.f32 %v483_v56, %v491_v55  ;;  %v468_v62 = vadd.f32 %v452_v58, %v420_v59  ;;  %v528_v58 = vsub.f32 %v1558_v21, %v1655_v52 }
  0xf5   : > { %v585_v15 = vmul.f32 %v1664_v60, %v573_v5  ;;  %v545_v0 = vmul.f32 %v1669_v61, %v533_v4 }
  0xf6   : > { %v1291_v11 = vpop.eup %1290  ;;  %v507_v12 = vadd.f32 1e-05, %v499_v1  ;;  %v484_v14 = vmul.f32 0.0078125, %v468_v62 }
  0xf7   : > { %v383_v2 = vpop.xlane.xlu1 %382  ;;  %v359_v19 = vpop.xlane.xlu0 %358  ;;  %v574_v22 = vmul.f32 %v1291_v11, %v566_v7  ;;  %v534_v23 = vmul.f32 %v1291_v11, %v526_v6  ;;  %v597_v25 = vadd.f32 %v1678_v9, %v585_v15  ;;  %v557_v26 = vadd.f32 %v1684_v18, %v545_v0 }
  0xf8   : > { %1292 = vrsqrt.f32 %v507_v12  ;;  %v500_v24 = vsub.f32 %v484_v14, %v492_v8  ;;  %v397_v30 = vadd.f32 %v383_v2, %v359_v19 }
  0xf9   : > { %v586_v27 = vmul.f32 %v1664_v60, %v574_v22  ;;  %v546_v28 = vmul.f32 %v1669_v61, %v534_v23  ;;  %1177 = vmatprep.mubr.msk.f32.mxu1 %vm344_vm0, %v597_v25  ;;  %1205 = vmatprep.mubr.msk.f32.mxu0 %vm344_vm0, %v557_v26 }
  0xfa   : > { %v508_v29 = vadd.f32 1e-05, %v500_v24  ;;  %v477_v39 = vmul.f32 0.0078125, %v397_v30 }
  0xfb   : > { %v386_v31 = vpop.xlane.xlu1 %385  ;;  %v362_v34 = vpop.xlane.xlu0 %361  ;;  %v598_v35 = vadd.f32 %v1678_v9, %v586_v27  ;;  %v558_v38 = vadd.f32 %v1684_v18, %v546_v28 }
  0xfc   : > { %1294 = vrsqrt.f32 %v508_v29  ;;  %v398_v40 = vadd.f32 %v386_v31, %v362_v34  ;;  %v493_v49 = vmul.f32 %v477_v39, %v477_v39  ;;  %v529_v28 = vsub.f32 %v1580_v33, %v477_v39 }
  0xfd   : > { %1178 = vmatmul.mubr.msk.f32.vlgmr.msra.gmra.mrb[0].mxu1 %vm344_vm0, %v598_v35  ;;  %1206 = vmatmul.mubr.msk.f32.vlgmr.msra.gmra.mrb[0].mxu0 %vm344_vm0, %v558_v38  ;;  %v569_v29 = vsub.f32 %v1577_v32, %v477_v39 }
  0xfe   : > { %v1701_v47 = vmul.f32 0.0078125, %v398_v40 }
  0xff   : > { %v455_v41 = vpop.xlane.xlu1 %454  ;;  %v423_v42 = vpop.xlane.xlu0 %422 }
 0x100   : > { %v469_v43 = vadd.f32 %v455_v41, %v423_v42  ;;  %v494_v62 = vmul.f32 %v1701_v47, %v1701_v47 }
 0x102   : > { %v1293_v46 = vpop.eup %1292  ;;  %v485_v50 = vmul.f32 0.0078125, %v469_v43 }
 0x103   : > { %v458_v51 = vpop.xlane.xlu1 %457  ;;  %v426_v53 = vpop.xlane.xlu0 %425  ;;  %v575_v54 = vmul.f32 %v1293_v46, %v567_v45  ;;  %v535_v55 = vmul.f32 %v1293_v46, %v527_v44  ;;  %v530_v45 = vsub.f32 %v1590_v37, %v1701_v47  ;;  %v570_v46 = vsub.f32 %v1587_v36, %v1701_v47 }
 0x104   : > { %v501_v56 = vsub.f32 %v485_v50, %v493_v49  ;;  %v470_v57 = vadd.f32 %v458_v51, %v426_v53 }
 0x105   : > { %v587_v59 = vmul.f32 %v1664_v60, %v575_v54  ;;  %v547_v16 = vmul.f32 %v1669_v61, %v535_v55 }
 0x106   : > { %v1295_v48 = vpop.eup %1294  ;;  %v509_v1 = vadd.f32 1e-05, %v501_v56  ;;  %v486_v5 = vmul.f32 0.0078125, %v470_v57 }
 0x107   : > { %v389_v4 = vpop.xlane.xlu1 %388  ;;  %v365_v6 = vpop.xlane.xlu0 %364  ;;  %v599_v7 = vadd.f32 %v1678_v9, %v587_v59  ;;  %v559_v8 = vadd.f32 %v1684_v18, %v547_v16  ;;  %v576_v21 = vmul.f32 %v1295_v48, %v568_v17  ;;  %v536_v11 = vmul.f32 %v1295_v48, %v528_v58 }
 0x108   : > { %1296 = vrsqrt.f32 %v509_v1  ;;  %v502_v20 = vsub.f32 %v486_v5, %v494_v62  ;;  %v399_v15 = vadd.f32 %v389_v4, %v365_v6 }
 0x109   : > { %1180 = vmatprep.mubr.msk.f32.mxu1 %vm344_vm0, %v599_v7  ;;  %1208 = vmatprep.mubr.msk.f32.mxu0 %vm344_vm0, %v559_v8  ;;  %v588_v52 = vmul.f32 %v1664_v60, %v576_v21  ;;  %v548_v12 = vmul.f32 %v1669_v61, %v536_v11 }
 0x10a   : > { %v510_v14 = vadd.f32 1e-05, %v502_v20  ;;  %v479_v23 = vmul.f32 0.0078125, %v399_v15 }
 0x10b   : > { %v392_v0 = vpop.xlane.xlu1 %391  ;;  %v368_v2 = vpop.xlane.xlu0 %367  ;;  %v600_v19 = vadd.f32 %v1678_v9, %v588_v52  ;;  %v560_v22 = vadd.f32 %v1684_v18, %v548_v12 }
 0x10c   : > { %1298 = vrsqrt.f32 %v510_v14  ;;  %v400_v24 = vadd.f32 %v392_v0, %v368_v2  ;;  %v495_v34 = vmul.f32 %v479_v23, %v479_v23  ;;  %v531_v59 = vsub.f32 %v1612_v3, %v479_v23 }
 0x10d   : > { %1181 = vmatmul.mubr.msk.f32.gmra.mrb[2].mxu1 %vm344_vm0, %v600_v19  ;;  %1209 = vmatmul.mubr.msk.f32.gmra.mrb[2].mxu0 %vm344_vm0, %v560_v22  ;;  %v571_v16 = vsub.f32 %v1609_v63, %v479_v23 }
 0x10e   : > { %v480_v31 = vmul.f32 0.0078125, %v400_v24 }
 0x10f   : > { %v461_v25 = vpop.xlane.xlu1 %460  ;;  %v429_v26 = vpop.xlane.xlu0 %428 }
 0x110   : > { %v471_v27 = vadd.f32 %v461_v25, %v429_v26  ;;  %v496_v50 = vmul.f32 %v480_v31, %v480_v31  ;;  %v532_v5 = vsub.f32 %v1622_v13, %v480_v31  ;;  %v572_v4 = vsub.f32 %v1619_v10, %v480_v31 }
 0x112   : > { %v1297_v30 = vpop.eup %1296  ;;  %v487_v35 = vmul.f32 0.0078125, %v471_v27 }
 0x113   : > { %v464_v38 = vpop.xlane.xlu1 %463  ;;  %v432_v40 = vpop.xlane.xlu0 %431  ;;  %v577_v41 = vmul.f32 %v1297_v30, %v569_v29  ;;  %v537_v42 = vmul.f32 %v1297_v30, %v529_v28 }
 0x114   : > { %v503_v43 = vsub.f32 %v487_v35, %v495_v34  ;;  %v472_v44 = vadd.f32 %v464_v38, %v432_v40 }
 0x115   : > { %v589_v33 = vmul.f32 %v1664_v60, %v577_v41  ;;  %v549_v32 = vmul.f32 %v1669_v61, %v537_v42 }
 0x116   : > { %v1299_v39 = vpop.eup %1298  ;;  %v511_v49 = vadd.f32 1e-05, %v503_v43  ;;  %v488_v51 = vmul.f32 0.0078125, %v472_v44 }
 0x117   : > { %v601_v53 = vadd.f32 %v1678_v9, %v589_v33  ;;  %v561_v54 = vadd.f32 %v1684_v18, %v549_v32  ;;  %v578_v55 = vmul.f32 %v1299_v39, %v570_v46  ;;  %v538_v56 = vmul.f32 %v1299_v39, %v530_v45  ;;  %v918_v12 = vpop.xlane.xlu1 %917  ;;  %v915_v14 = vpop.xlane.xlu0 %914 }
 0x118   : > { %1300 = vrsqrt.f32 %v511_v49  ;;  %v504_v57 = vsub.f32 %v488_v51, %v496_v50  ;;  %939 = vst.msk [vmem:[%s325_s7 + $0x8] sm:$0xff] %vm937_vm2, %v918_v12  ;;  %938 = vst.msk [vmem:[%s325_s7] sm:$0xff] %vm937_vm2, %v915_v14 }
 0x119   : > { %1183 = vmatprep.mubr.msk.f32.mxu1 %vm344_vm0, %v601_v53  ;;  %1211 = vmatprep.mubr.msk.f32.mxu0 %vm344_vm0, %v561_v54  ;;  %v590_v36 = vmul.f32 %v1664_v60, %v578_v55  ;;  %v550_v37 = vmul.f32 %v1669_v61, %v538_v56 }
 0x11a   : > { %v512_v47 = vadd.f32 1e-05, %v504_v57 }
 0x11b   : > { %v602_v58 = vadd.f32 %v1678_v9, %v590_v36  ;;  %v562_v17 = vadd.f32 %v1684_v18, %v550_v37 }
 0x11c   : > { %1302 = vrsqrt.f32 %v512_v47 }
 0x11d   : > { %1184 = vmatmul.mubr.msk.f32.gmra.mrb[4].mxu1 %vm344_vm0, %v602_v58  ;;  %1212 = vmatmul.mubr.msk.f32.gmra.mrb[4].mxu0 %vm344_vm0, %v562_v17 }
 0x122   : > { %v1301_v48 = vpop.eup %1300 }
 0x123   : > { %v579_v1 = vmul.f32 %v1301_v48, %v571_v16  ;;  %v539_v62 = vmul.f32 %v1301_v48, %v531_v59 }
 0x125   : > { %v591_v6 = vmul.f32 %v1664_v60, %v579_v1  ;;  %v551_v7 = vmul.f32 %v1669_v61, %v539_v62 }
 0x126   : > { %v1303_v8 = vpop.eup %1302 }
 0x127   : > { %v603_v21 = vadd.f32 %v1678_v9, %v591_v6  ;;  %v563_v11 = vadd.f32 %v1684_v18, %v551_v7  ;;  %v580_v3 = vmul.f32 %v1303_v8, %v572_v4  ;;  %v540_v20 = vmul.f32 %v1303_v8, %v532_v5 }
 0x129   : > { %1186 = vmatprep.mubr.msk.f32.mxu1 %vm344_vm0, %v603_v21  ;;  %1214 = vmatprep.mubr.msk.f32.mxu0 %vm344_vm0, %v563_v11  ;;  %v592_v63 = vmul.f32 %v1664_v60, %v580_v3  ;;  %v552_v10 = vmul.f32 %v1669_v61, %v540_v20  ;;  %v924_v60 = vpop.xlane.xlu1 %923  ;;  %v921_v61 = vpop.xlane.xlu0 %920 }
 0x12a   : > { %941 = vst.msk [vmem:[%s325_s7 + $0x18] sm:$0xff] %vm937_vm2, %v924_v60  ;;  %940 = vst.msk [vmem:[%s325_s7 + $0x10] sm:$0xff] %vm937_vm2, %v921_v61 }
 0x12b   : > { %v604_v13 = vadd.f32 %v1678_v9, %v592_v63  ;;  %v564_v52 = vadd.f32 %v1684_v18, %v552_v10 }
 0x12d   : > { %1187 = vmatmul.mubr.msk.f32.gmra.mrb[6].mxu1 %vm344_vm0, %v604_v13  ;;  %1215 = vmatmul.mubr.msk.f32.gmra.mrb[6].mxu0 %vm344_vm0, %v564_v52  ;;  %v930_v9 = vpop.xlane.xlu1 %929  ;;  %v927_v18 = vpop.xlane.xlu0 %926 }
 0x12e   : > { %943 = vst.msk [vmem:[%s325_s7 + $0x28] sm:$0xff] %vm937_vm2, %v930_v9  ;;  %942 = vst.msk [vmem:[%s325_s7 + $0x20] sm:$0xff] %vm937_vm2, %v927_v18 }
 0x131   : > { %v936_v15 = vpop.xlane.xlu1 %935  ;;  %v933_v0 = vpop.xlane.xlu0 %932 }
 0x132   : > { %945 = vst.msk [vmem:[%s325_s7 + $0x38] sm:$0xff] %vm937_vm2, %v936_v15  ;;  %944 = vst.msk [vmem:[%s325_s7 + $0x30] sm:$0xff] %vm937_vm2, %v933_v0 }
 0x1d0   : > { %v1179_v2 = vpop.f32.mrb[0].mxu1  ;;  %v1207_v19 = vpop.f32.mrb[0].mxu0 }
 0x1d1   : > { %v846_v22 = vadd.f32 %v1207_v19, %v1179_v2  ;;  %v711_v23 = vpop.f32.mrb[1].mxu1  ;;  %v840_v24 = vpop.f32.mrb[1].mxu0 }
 0x1d2   : > { %v841_v25 = vadd.f32 %v840_v24, %v711_v23 }
 0x1d3   : > { %880 = vst.msk [vmem:[%s1770_s9 + $0x8] sm:$0xff] %vm344_vm0, %v846_v22 }
 0x1d4   : > { %879 = vst.msk [vmem:[%s1770_s9] sm:$0xff] %vm344_vm0, %v841_v25 }
 0x1e0   : > { %v1182_v26 = vpop.f32.mrb[2].mxu1  ;;  %v1210_v27 = vpop.f32.mrb[2].mxu0 }
 0x1e1   : > { %v856_v28 = vadd.f32 %v1210_v27, %v1182_v26  ;;  %v721_v29 = vpop.f32.mrb[3].mxu1  ;;  %v850_v30 = vpop.f32.mrb[3].mxu0 }
 0x1e2   : > { %v851_v31 = vadd.f32 %v850_v30, %v721_v29 }
 0x1e3   : > { %882 = vst.msk [vmem:[%s1770_s9 + $0x18] sm:$0xff] %vm344_vm0, %v856_v28 }
 0x1e4   : > { %881 = vst.msk [vmem:[%s1770_s9 + $0x10] sm:$0xff] %vm344_vm0, %v851_v31 }
 0x1f0   : > { %v1185_v34 = vpop.f32.mrb[4].mxu1  ;;  %v1213_v35 = vpop.f32.mrb[4].mxu0 }
 0x1f1   : > { %v866_v38 = vadd.f32 %v1213_v35, %v1185_v34  ;;  %v731_v40 = vpop.f32.mrb[5].mxu1  ;;  %v860_v41 = vpop.f32.mrb[5].mxu0 }
 0x1f2   : > { %v861_v42 = vadd.f32 %v860_v41, %v731_v40 }
 0x1f3   : > { %884 = vst.msk [vmem:[%s1770_s9 + $0x28] sm:$0xff] %vm344_vm0, %v866_v38 }
 0x1f4   : > { %883 = vst.msk [vmem:[%s1770_s9 + $0x20] sm:$0xff] %vm344_vm0, %v861_v42 }
 0x200   : > { %v1188_v43 = vpop.f32.mrb[6].mxu1  ;;  %v1216_v44 = vpop.f32.mrb[6].mxu0 }
 0x201   : > { %v876_v45 = vadd.f32 %v1216_v44, %v1188_v43  ;;  %v741_v46 = vpop.f32.mrb[7].mxu1  ;;  %v870_v33 = vpop.f32.mrb[7].mxu0 }
 0x202   : > { %v871_v32 = vadd.f32 %v870_v33, %v741_v46 }
 0x203   : > { %886 = vst.msk [vmem:[%s1770_s9 + $0x38] sm:$0xff] %vm344_vm0, %v876_v45 }
 0x204   : > { %885 = vst.msk [vmem:[%s1770_s9 + $0x30] sm:$0xff] %vm344_vm0, %v871_v32 }
 0x205 PF: > { %s19_s21 = sadd.s32 1, %s1374_s21  }
 0x206   : > { %p16_p5 = scmp.ge.s32.totalorder %s19_s21, 4  }
 0x208   :  { %18 = sbr.rel (!%p16_p5) target bundleno = 2 (0x2), region = 96 }
 0x20f   :  { %985 = vsyncpa [#allocation3], 1 }
 0x210   :  { %987 = vsyncpa [#allocation3 + $0x1], 1 }
 0x211   :  { %988 = vsyncpa [#allocation5], 1 }

</bundles_post_ra>
